<compile_context>
chip_gen: v5e
topology: v5e:2x2
jax: 0.10.0
libtpu: 0.0.40
codegen_flags: <defaults>
</compile_context>

<pallas_src>
import functools

import jax
import jax.numpy as jnp
from jax.experimental import pallas as pl
from jax.experimental.pallas import tpu as pltpu

LANE = 128


def _round_up(n, m):
    return ((n + m - 1) // m) * m


def _pick_tile(n):
    """Largest tile in {128,256,512,1024} giving >=2 row tiles when possible."""
    n128 = _round_up(n, LANE)
    for t in (1024, 512, 256):
        if n128 >= 2 * t:
            return t
    return LANE


# ----------------------------------------------------------------------------
# One GraphConv layer:  out = maybe_relu( (A @ x) @ W_rel + x @ W_root + b )
# grid = (row tiles i, reduction tiles k over A columns / source nodes)
# ----------------------------------------------------------------------------
def _graph_conv_kernel(a_ref, x_ref, w_rel_ref, w_root_ref, b_ref,
                       out_ref, acc_ref, *, apply_relu):
    i = pl.program_id(0)
    k = pl.program_id(1)
    tm = acc_ref.shape[0]
    tk = a_ref.shape[1]

    @pl.when(k == 0)
    def _():
        acc_ref[...] = jnp.zeros_like(acc_ref)

    # A arrives as int8 (exact small edge multiplicities); upcast to bf16 on
    # the VPU so the accumulation matmul runs in the MXU's native bf16 mode,
    # accumulating in f32.
    a = a_ref[...].astype(jnp.bfloat16)
    x_src = x_ref[pl.ds(pl.multiple_of(k * tk, tk), tk), :]        # bf16 rows
    acc_ref[...] += jnp.dot(a, x_src, preferred_element_type=jnp.float32)

    @pl.when(k == pl.num_programs(1) - 1)
    def _():
        # Two small f32 dots (once per row tile) — no [acc | x_dst] concat temp.
        x_dst = x_ref[pl.ds(pl.multiple_of(i * tm, tm), tm), :].astype(jnp.float32)
        y = (jnp.dot(acc_ref[...], w_rel_ref[...],
                     preferred_element_type=jnp.float32)
             + jnp.dot(x_dst, w_root_ref[...],
                       preferred_element_type=jnp.float32)
             + b_ref[...])
        if apply_relu:
            y = jnp.maximum(y, 0.0)
        out_ref[...] = y.astype(out_ref.dtype)


def _graph_conv(a_i8, x_bf16, w_rel, w_root, b, *, apply_relu, out_dtype, tm, tk):
    n_pad = a_i8.shape[0]
    fin = x_bf16.shape[1]
    fout = w_rel.shape[1]
    grid = (n_pad // tm, n_pad // tk)

    flops = int(2 * n_pad * n_pad * fin + 4 * n_pad * fin * fout)
    bytes_accessed = int(a_i8.size                                  # int8
                         + x_bf16.size * 2                          # bf16, read once
                         + (w_rel.size + w_root.size + b.size) * 4  # f32
                         + n_pad * fout * jnp.dtype(out_dtype).itemsize)

    kernel = functools.partial(_graph_conv_kernel, apply_relu=apply_relu)

    return pl.pallas_call(
        kernel,
        out_shape=jax.ShapeDtypeStruct((n_pad, fout), out_dtype),
        grid_spec=pltpu.PrefetchScalarGridSpec(
            num_scalar_prefetch=0,
            grid=grid,
            in_specs=[
                pl.BlockSpec((tm, tk), lambda i, k: (i, k)),        # A[dst, src] int8
                pl.BlockSpec((n_pad, fin), lambda i, k: (0, 0)),    # x, VMEM-resident
                pl.BlockSpec((fin, fout), lambda i, k: (0, 0)),     # W_rel
                pl.BlockSpec((fin, fout), lambda i, k: (0, 0)),     # W_root
                pl.BlockSpec((1, fout), lambda i, k: (0, 0)),       # bias
            ],
            out_specs=pl.BlockSpec((tm, fout), lambda i, k: (i, 0)),
            scratch_shapes=[pltpu.VMEM((tm, fin), jnp.float32)],
        ),
        compiler_params=pltpu.CompilerParams(
            dimension_semantics=("parallel", "arbitrary"),
            vmem_limit_bytes=48 * 1024 * 1024,   # safe on v7x (64 MiB physical)
        ),
        cost_estimate=pl.CostEstimate(
            flops=flops, transcendentals=0, bytes_accessed=bytes_accessed),
    )(a_i8, x_bf16, w_rel, w_root, b)


# ----------------------------------------------------------------------------
# Full Generator forward
# ----------------------------------------------------------------------------
def generator_forward(x, edge_index, params):
    """x: [N, Fin] float32, edge_index: [2, E] int32 (row0=src, row1=dst)."""
    N, fin = x.shape
    hid = params["w1_rel"].shape[1]
    fout = params["w2_rel"].shape[1]

    tile = _pick_tile(N)
    tm = tk = tile
    n_pad = _round_up(N, tile)
    fin_p = _round_up(fin, LANE)
    hid_p = _round_up(hid, LANE)
    fout_p = _round_up(fout, LANE)

    # Dense aggregation matrix A[dst, src] += 1, built directly in int8
    # (exact for multiplicity <= 127; 1/4 the HBM bytes of f32).
    src, dst = edge_index[0], edge_index[1]
    A = jnp.zeros((n_pad, n_pad), jnp.int8).at[dst, src].add(jnp.int8(1))

    def pad2(m, r, c, dtype=jnp.float32):
        return jnp.pad(m.astype(dtype),
                       ((0, r - m.shape[0]), (0, c - m.shape[1])))

    # Activations in bf16 (MXU-native). A's padded columns are exact zeros, so
    # padded rows never contaminate valid outputs; padded output rows are
    # sliced off below.
    x_p = pad2(x, n_pad, fin_p, jnp.bfloat16)

    w1_rel = pad2(params["w1_rel"], fin_p, hid_p)
    w1_root = pad2(params["w1_root"], fin_p, hid_p)
    b1 = pad2(params["b1"], 1, hid_p)
    w2_rel = pad2(params["w2_rel"], hid_p, fout_p)
    w2_root = pad2(params["w2_root"], hid_p, fout_p)
    b2 = pad2(params["b2"], 1, fout_p)

    # Layer 1: ReLU fused in-kernel, bf16 output (halves interlayer traffic).
    h = _graph_conv(A, x_p, w1_rel, w1_root, b1,
                    apply_relu=True, out_dtype=jnp.bfloat16, tm=tm, tk=tk)
    # Layer 2: f32 output (final embeddings).
    emb_p = _graph_conv(A, h, w2_rel, w2_root, b2,
                        apply_relu=False, out_dtype=jnp.float32, tm=tm, tk=tk)

    emb = emb_p[:N, :fout]
    out = jnp.maximum(emb, 0.0)   # relu(emb) in the wrapper (XLA fuses slice+relu)
    return emb, out


# ----------------------------------------------------------------------------
# Pure-JAX f32 reference mirroring PyG GraphConv
# ----------------------------------------------------------------------------
def reference_forward(x, edge_index, params):
    N = x.shape[0]
    src, dst = edge_index[0], edge_index[1]
    A = jnp.zeros((N, N), jnp.float32).at[dst, src].add(1.0)
    h = (A @ x) @ params["w1_rel"] + x @ params["w1_root"] + params["b1"]
    h = jnp.maximum(h, 0.0)
    emb = (A @ h) @ params["w2_rel"] + h @ params["w2_root"] + params["b2"]
    return emb, jnp.maximum(emb, 0.0)


def init_params(key, in_feats, hidden_feats, out_feats):
    ks = jax.random.split(key, 6)
    s1 = 1.0 / jnp.sqrt(jnp.float32(max(in_feats, 1)))
    s2 = 1.0 / jnp.sqrt(jnp.float32(max(hidden_feats, 1)))
    return {
        "w1_rel":  s1 * jax.random.normal(ks[0], (in_feats, hidden_feats), jnp.float32),
        "w1_root": s1 * jax.random.normal(ks[1], (in_feats, hidden_feats), jnp.float32),
        "b1":      0.1 * jax.random.normal(ks[2], (1, hidden_feats), jnp.float32),
        "w2_rel":  s2 * jax.random.normal(ks[3], (hidden_feats, out_feats), jnp.float32),
        "w2_root": s2 * jax.random.normal(ks[4], (hidden_feats, out_feats), jnp.float32),
        "b2":      0.1 * jax.random.normal(ks[5], (1, out_feats), jnp.float32),
    }


if __name__ == "__main__":
    # Shapes consistent with the module: in_feats=1, hidden_feats=128,
    # out_feats=1; 32 graph nodes on a bidirectional ring.
    N, IN_FEATS, HIDDEN, OUT_FEATS = 32, 1, 128, 1

    key = jax.random.PRNGKey(0)
    kx, kp = jax.random.split(key)

    x = jax.random.normal(kx, (N, IN_FEATS), jnp.float32)

    idx = jnp.arange(N, dtype=jnp.int32)
    src = jnp.concatenate([idx, (idx + 1) % N])
    dst = jnp.concatenate([(idx + 1) % N, idx])
    edge_index = jnp.stack([src, dst], axis=0)          # [2, 2N]

    params = init_params(kp, IN_FEATS, HIDDEN, OUT_FEATS)

    emb, out = generator_forward(x, edge_index, params)
    jax.block_until_ready((emb, out))

    emb_ref, out_ref = reference_forward(x, edge_index, params)
    # bf16 activations / interlayer h -> looser tolerance vs the f32 reference.
    assert jnp.allclose(emb, emb_ref, atol=5e-2, rtol=5e-2), \
        float(jnp.max(jnp.abs(emb - emb_ref)))
    assert jnp.allclose(out, out_ref, atol=5e-2, rtol=5e-2), \
        float(jnp.max(jnp.abs(out - out_ref)))

    print("KERNEL_OK")
</pallas_src>

<mosaic_0001>
module attributes {stable_mosaic.version = 11 : i64} {
  func.func @_graph_conv_kernel(%arg0: i32, %arg1: i32, %arg2: memref<128x128xi8, #tpu.memory_space<vmem>>, %arg3: memref<128x128xbf16, #tpu.memory_space<vmem>>, %arg4: memref<128x128xf32, #tpu.memory_space<vmem>>, %arg5: memref<128x128xf32, #tpu.memory_space<vmem>>, %arg6: memref<1x128xf32, #tpu.memory_space<vmem>>, %arg7: memref<128x128xbf16, #tpu.memory_space<vmem>>, %arg8: memref<128x128xf32, #tpu.memory_space<vmem>>) attributes {dimension_semantics = [#tpu.dimension_semantics<parallel>, #tpu.dimension_semantics<arbitrary>], iteration_bounds = array<i64: 1, 1>, scalar_prefetch = 0 : i64, scratch_operands = 1 : i64, tpu.core_type = #tpu.core_type<tc>, window_params = [{transform_indices = @transform_0, window_bounds = array<i64: 128, 128>}, {pipeline_mode = #tpu.pipeline_mode<synchronous>, transform_indices = @transform_1, window_bounds = array<i64: 128, 128>}, {pipeline_mode = #tpu.pipeline_mode<synchronous>, transform_indices = @transform_2, window_bounds = array<i64: 128, 128>}, {pipeline_mode = #tpu.pipeline_mode<synchronous>, transform_indices = @transform_3, window_bounds = array<i64: 128, 128>}, {pipeline_mode = #tpu.pipeline_mode<synchronous>, transform_indices = @transform_4, window_bounds = array<i64: 1, 128>}, {transform_indices = @transform_5, window_bounds = array<i64: 128, 128>}]} {
    %c0_i32 = arith.constant 0 : i32
    %0 = arith.cmpi eq, %arg1, %c0_i32 : i32
    %1 = arith.extui %0 : i1 to i32
    %c0_i32_0 = arith.constant 0 : i32
    %2 = arith.cmpi ne, %1, %c0_i32_0 : i32
    scf.if %2 {
      %cst_9 = arith.constant 0.000000e+00 : f32
      %16 = vector.broadcast %cst_9 : f32 to vector<128x128xf32>
      %c0_10 = arith.constant 0 : index
      %c0_11 = arith.constant 0 : index
      %17 = vector.load %arg8[%c0_10, %c0_11] : memref<128x128xf32, #tpu.memory_space<vmem>>, vector<128x128xf32>
      tpu.vector_store %arg8[%c0_10, %c0_11], %16 {strides = array<i32>} : memref<128x128xf32, #tpu.memory_space<vmem>>, vector<128x128xf32>,
    } else {
    }
    %c0 = arith.constant 0 : index
    %c0_1 = arith.constant 0 : index
    %3 = vector.load %arg2[%c0, %c0_1] : memref<128x128xi8, #tpu.memory_space<vmem>>, vector<128x128xi8>
    %4 = arith.sitofp %3 : vector<128x128xi8> to vector<128x128xbf16>
    %c128_i32 = arith.constant 128 : i32
    %5 = arith.muli %arg1, %c128_i32 : i32
    %6 = tpu.assume_multiple %5, 128 : i32
    %7 = arith.index_cast %6 : i32 to index
    %c0_2 = arith.constant 0 : index
    %8 = vector.load %arg3[%7, %c0_2] : memref<128x128xbf16, #tpu.memory_space<vmem>>, vector<128x128xbf16>
    %c0_3 = arith.constant 0 : index
    %c0_4 = arith.constant 0 : index
    %9 = vector.load %arg8[%c0_3, %c0_4] : memref<128x128xf32, #tpu.memory_space<vmem>>, vector<128x128xf32>
    %cst = arith.constant dense<0.000000e+00> : vector<128x128xf32>
    %10 = tpu.matmul %4, %8, %cst {dimension_numbers = #tpu.dot_dimension_numbers<[1], [0], [0], [1], [0, 0, 1, 1], [], []>} : vector<128x128xbf16>, vector<128x128xbf16>, vector<128x128xf32> -> vector<128x128xf32>
    %11 = arith.addf %9, %10 : vector<128x128xf32>
    %c0_5 = arith.constant 0 : index
    %c0_6 = arith.constant 0 : index
    %12 = vector.load %arg8[%c0_5, %c0_6] : memref<128x128xf32, #tpu.memory_space<vmem>>, vector<128x128xf32>
    tpu.vector_store %arg8[%c0_5, %c0_6], %11 {strides = array<i32>} : memref<128x128xf32, #tpu.memory_space<vmem>>, vector<128x128xf32>,
    %c0_i32_7 = arith.constant 0 : i32
    %13 = arith.cmpi eq, %arg1, %c0_i32_7 : i32
    %14 = arith.extui %13 : i1 to i32
    %c0_i32_8 = arith.constant 0 : i32
    %15 = arith.cmpi ne, %14, %c0_i32_8 : i32
    scf.if %15 {
      %c128_i32_9 = arith.constant 128 : i32
      %16 = arith.muli %arg0, %c128_i32_9 : i32
      %17 = tpu.assume_multiple %16, 128 : i32
      %18 = arith.index_cast %17 : i32 to index
      %c0_10 = arith.constant 0 : index
      %19 = vector.load %arg3[%18, %c0_10] : memref<128x128xbf16, #tpu.memory_space<vmem>>, vector<128x128xbf16>
      %20 = arith.extf %19 : vector<128x128xbf16> to vector<128x128xf32>
      %c0_11 = arith.constant 0 : index
      %c0_12 = arith.constant 0 : index
      %21 = vector.load %arg8[%c0_11, %c0_12] : memref<128x128xf32, #tpu.memory_space<vmem>>, vector<128x128xf32>
      %c0_13 = arith.constant 0 : index
      %c0_14 = arith.constant 0 : index
      %22 = vector.load %arg4[%c0_13, %c0_14] : memref<128x128xf32, #tpu.memory_space<vmem>>, vector<128x128xf32>
      %cst_15 = arith.constant dense<0.000000e+00> : vector<128x128xf32>
      %23 = tpu.matmul %21, %22, %cst_15 {dimension_numbers = #tpu.dot_dimension_numbers<[1], [0], [0], [1], [0, 0, 1, 1], [], []>} : vector<128x128xf32>, vector<128x128xf32>, vector<128x128xf32> -> vector<128x128xf32>
      %c0_16 = arith.constant 0 : index
      %c0_17 = arith.constant 0 : index
      %24 = vector.load %arg5[%c0_16, %c0_17] : memref<128x128xf32, #tpu.memory_space<vmem>>, vector<128x128xf32>
      %cst_18 = arith.constant dense<0.000000e+00> : vector<128x128xf32>
      %25 = tpu.matmul %20, %24, %cst_18 {dimension_numbers = #tpu.dot_dimension_numbers<[1], [0], [0], [1], [0, 0, 1, 1], [], []>} : vector<128x128xf32>, vector<128x128xf32>, vector<128x128xf32> -> vector<128x128xf32>
      %26 = arith.addf %23, %25 : vector<128x128xf32>
      %c0_19 = arith.constant 0 : index
      %c0_20 = arith.constant 0 : index
      %27 = vector.load %arg6[%c0_19, %c0_20] : memref<1x128xf32, #tpu.memory_space<vmem>>, vector<1x128xf32>
      %28 = vector.broadcast %27 : vector<1x128xf32> to vector<128x128xf32>
      %29 = arith.addf %26, %28 : vector<128x128xf32>
      %cst_21 = arith.constant 0.000000e+00 : f32
      %30 = vector.broadcast %cst_21 : f32 to vector<128x128xf32>
      %31 = arith.maximumf %29, %30 : vector<128x128xf32>
      %32 = arith.truncf %31 : vector<128x128xf32> to vector<128x128xbf16>
      %c0_22 = arith.constant 0 : index
      %c0_23 = arith.constant 0 : index
      %33 = vector.load %arg7[%c0_22, %c0_23] : memref<128x128xbf16, #tpu.memory_space<vmem>>, vector<128x128xbf16>
      tpu.vector_store %arg7[%c0_22, %c0_23], %32 {strides = array<i32>} : memref<128x128xbf16, #tpu.memory_space<vmem>>, vector<128x128xbf16>,
    } else {
    }
    return
  }
  func.func @transform_0(%arg0: i32, %arg1: i32) -> (i32, i32) {
    %c0_i32 = arith.constant 0 : i32
    return %arg0, %arg1 : i32, i32
  }
  func.func @transform_1(%arg0: i32, %arg1: i32) -> (i32, i32) {
    %c0_i32 = arith.constant 0 : i32
    %c0_i32_0 = arith.constant 0 : i32
    %c0_i32_1 = arith.constant 0 : i32
    return %c0_i32, %c0_i32_0 : i32, i32
  }
  func.func @transform_2(%arg0: i32, %arg1: i32) -> (i32, i32) {
    %c0_i32 = arith.constant 0 : i32
    %c0_i32_0 = arith.constant 0 : i32
    %c0_i32_1 = arith.constant 0 : i32
    return %c0_i32, %c0_i32_0 : i32, i32
  }
  func.func @transform_3(%arg0: i32, %arg1: i32) -> (i32, i32) {
    %c0_i32 = arith.constant 0 : i32
    %c0_i32_0 = arith.constant 0 : i32
    %c0_i32_1 = arith.constant 0 : i32
    return %c0_i32, %c0_i32_0 : i32, i32
  }
  func.func @transform_4(%arg0: i32, %arg1: i32) -> (i32, i32) {
    %c0_i32 = arith.constant 0 : i32
    %c0_i32_0 = arith.constant 0 : i32
    %c0_i32_1 = arith.constant 0 : i32
    return %c0_i32, %c0_i32_0 : i32, i32
  }
  func.func @transform_5(%arg0: i32, %arg1: i32) -> (i32, i32) {
    %c0_i32 = arith.constant 0 : i32
    %c0_i32_0 = arith.constant 0 : i32
    return %arg0, %c0_i32 : i32, i32
  }
}

</mosaic_0001>

<bundles_post_ra>
// kernel: tpu_custom_call.1
= control target key start
LH: loop header
LB: loop body
LE: loop exit
PB: predicated region body
PF: predicated region fallthrough
CT: control target
= control target key end

     0   :  { %10 = vsyncpa [#allocation4], 0  ;;  %s1052_s0 = inlined_call_operand.hbm [shape: s8[128,128], index: 0, kind: input, shape index: {}]   ;;  %s1053_s1 = inlined_call_operand.hbm [shape: bf16[128,128], index: 1, kind: input, shape index: {}]   ;;  %s1054_s2 = inlined_call_operand.hbm [shape: f32[128,128], index: 2, kind: input, shape index: {}]   ;;  %s1055_s3 = inlined_call_operand.hbm [shape: f32[128,128], index: 3, kind: input, shape index: {}]   ;;  %s1056_s4 = inlined_call_operand.vmem [shape: f32[1,128], index: 4, kind: input, shape index: {}]   ;;  %s1057_s5 = inlined_call_operand.hbm [shape: bf16[128,128], index: 5, kind: output, shape index: {}]  }
   0x1   :  { %11 = vsyncpa [#allocation7], 0 }
   0x2   :  { %12 = vsyncpa [#allocation10], 0  ;;  %s31_s20 = sshll.u32 %s1053_s1, 4  ;;  %s32_s20 = int_to_ptr.hbm [resolvable:$true] %s31_s20 }
   0x3   :  { %13 = vsyncpa [#allocation5], 0  ;;  %s929_s21 = smov [#allocation6]   ;;  %s18_s25 = sshll.u32 %s1052_s0, 4  ;;  %s19_s25 = int_to_ptr.hbm [resolvable:$true] %s18_s25 }
   0x4   :  { %s33_s22 = sshll.u32 %s929_s21, 4  ;;  %s930_s26 = smov 64   ;;  %s34_s22 = int_to_ptr.vmem [resolvable:$true] %s33_s22 }
   0x5   :  { %s931_s27 = smov 4   ;;  %s932_s28 = smov [#allocation3]  }
   0x6   :  { %39 = dma.hbm_to_vmem [thread:$0]  %s32_s20, 1024, %s34_s22, [#allocation7], %s930_s26, %s930_s26, %s931_s27  }
   0x7   :  { %s20_s29 = sshll.u32 %s932_s28, 4  ;;  %s933_s1 = smov 128   ;;  %s21_s29 = int_to_ptr.vmem [resolvable:$true] %s20_s29 }
   0x8   :  { %s934_s30 = smov 8   ;;  %s44_s8 = sshll.u32 %s1054_s2, 4  ;;  %s45_s8 = int_to_ptr.hbm [resolvable:$true] %s44_s8 }
   0x9   :  { %26 = dma.hbm_to_vmem [thread:$0]  %s19_s25, 512, %s21_s29, [#allocation4], %s933_s1, %s933_s1, %s934_s30  }
   0xa   :  { %s935_s9 = smov [#allocation8]   ;;  %s57_s12 = sshll.u32 %s1055_s3, 4  ;;  %s58_s12 = int_to_ptr.hbm [resolvable:$true] %s57_s12 }
   0xb   :  { %s46_s0 = sshll.u32 %s935_s9, 4  ;;  %s936_s13 = smov [#allocation9]   ;;  %s47_s0 = int_to_ptr.vmem [resolvable:$true] %s46_s0 }
   0xc   :  { %52 = dma.hbm_to_vmem [thread:$0]  %s45_s8, 2048, %s47_s0, [#allocation7], %s933_s1, %s933_s1, %s934_s30  }
   0xd   :  { %s59_s14 = sshll.u32 %s936_s13, 4  ;;  %s60_s14 = int_to_ptr.vmem [resolvable:$true] %s59_s14 }
   0xe   :  { %65 = dma.hbm_to_vmem [thread:$0]  %s58_s12, 2048, %s60_s14, [#allocation10], %s933_s1, %s933_s1, %s934_s30  }
   0xf   :  { %921 = dma.done.wait [#allocation4], 512  }
  0x10   :  { %922 = vsyncadd [#allocation4], 4294966784 }
  0x11   :  { %923 = dma.done.wait [#allocation7], 3072  }
  0x12   :  { %924 = vsyncadd [#allocation7], 4294964224 }
  0x13   :  { %925 = dma.done.wait [#allocation10], 2048  }
  0x14   :  { %926 = vsyncadd [#allocation10], 4294965248  ;;  %v664_v0 = vld [vmem:[#allocation6 + $0x38] sm:$0xff]  ;;  %v663_v1 = vld [vmem:[#allocation6 + $0x30] sm:$0xff]  ;;  %s606_s18 = sshll.u32 %s1057_s5, 4  ;;  %s607_s18 = int_to_ptr.hbm [resolvable:$true] %s606_s18 }
  0x15   :  { %233 = vmatpush.bf16.msra.mxu0 %v664_v0  ;;  %751 = vmatpush.bf16.msra.mxu3 %v664_v0  ;;  %v662_v2 = vld [vmem:[#allocation6 + $0x28] sm:$0xff]  ;;  %v661_v3 = vld [vmem:[#allocation6 + $0x20] sm:$0xff]  ;;  %v660_v4 = vld [vmem:[#allocation6 + $0x18] sm:$0xff] }
  0x16   :  { %v659_v5 = vld [vmem:[#allocation6 + $0x10] sm:$0xff]  ;;  %v104_v6 = vld [vmem:[#allocation3] sm:$0xff]  ;;  %v107_v7 = vld [vmem:[#allocation3 + $0x18] sm:$0xff] }
  0x17   :  { %v108_v8 = vunpack.c.0.s8 %v104_v6  ;;  %v109_v9 = vunpack.c.1.s8 %v104_v6  ;;  %v120_v10 = vunpack.c.0.s8 %v107_v7  ;;  %v121_v11 = vunpack.c.1.s8 %v107_v7  ;;  %v658_v12 = vld [vmem:[#allocation6 + $0x8] sm:$0xff]  ;;  %v657_v17 = vld [vmem:[#allocation6] sm:$0xff]  ;;  %v401_v41 = vld [vmem:[#allocation9 + $0x78] sm:$0xff] }
  0x18   :  { %v110_v20 = vunpack.c.2.s8 %v104_v6  ;;  %v111_v21 = vunpack.c.3.s8 %v104_v6  ;;  %v122_v22 = vunpack.c.2.s8 %v107_v7  ;;  %v123_v23 = vunpack.c.3.s8 %v107_v7  ;;  %v105_v30 = vld [vmem:[#allocation3 + $0x8] sm:$0xff]  ;;  %v400_v42 = vld [vmem:[#allocation9 + $0x70] sm:$0xff]  ;;  %v985_v44 = vld [vmem:[#allocation8 + $0x78] sm:$0xff]  ;;  %402 = vmatpush.msra.mxu1 %v401_v41 }
  0x19   :  { %234 = vmatpush.bf16.msra.mxu0 %v663_v1  ;;  %752 = vmatpush.bf16.msra.mxu3 %v663_v1  ;;  %v124_v13 = vcvt.s32.f32 %v108_v8  ;;  %v125_v14 = vcvt.s32.f32 %v109_v9  ;;  %v136_v15 = vcvt.s32.f32 %v120_v10  ;;  %v137_v16 = vcvt.s32.f32 %v121_v11  ;;  %v983_v43 = vld [vmem:[#allocation3 + $0x10] sm:$0xff]  ;;  %v399_v45 = vld [vmem:[#allocation9 + $0x68] sm:$0xff]  ;;  %v398_v50 = vld [vmem:[#allocation9 + $0x60] sm:$0xff] }
  0x1a   :  { %v126_v24 = vcvt.s32.f32 %v110_v20  ;;  %v127_v25 = vcvt.s32.f32 %v111_v21  ;;  %v138_v26 = vcvt.s32.f32 %v122_v22  ;;  %v139_v27 = vcvt.s32.f32 %v123_v23  ;;  %467 = vmatpush.msra.mxu2 %v985_v44  ;;  %v988_v46 = vld [vmem:[#allocation8 + $0x70] sm:$0xff]  ;;  %v990_v47 = vld [vmem:[#allocation8 + $0x68] sm:$0xff]  ;;  %403 = vmatpush.msra.mxu1 %v400_v42  ;;  %v995_v51 = vld [vmem:[#allocation8 + $0x60] sm:$0xff] }
  0x1b   :  { %v140_v18 = vpack.c.bf16 %v125_v14, %v124_v13  ;;  %v146_v19 = vpack.c.bf16 %v137_v16, %v136_v15  ;;  %v112_v31 = vunpack.c.0.s8 %v105_v30  ;;  %v113_v32 = vunpack.c.1.s8 %v105_v30  ;;  %v397_v52 = vld [vmem:[#allocation9 + $0x58] sm:$0xff]  ;;  %v396_v56 = vld [vmem:[#allocation9 + $0x50] sm:$0xff]  ;;  %v395_v58 = vld [vmem:[#allocation9 + $0x48] sm:$0xff] }
  0x1c   :  { %v141_v28 = vpack.c.bf16 %v127_v25, %v126_v24  ;;  %v147_v29 = vpack.c.bf16 %v139_v27, %v138_v26  ;;  %v114_v36 = vunpack.c.2.s8 %v105_v30  ;;  %v115_v37 = vunpack.c.3.s8 %v105_v30  ;;  %468 = vmatpush.msra.mxu2 %v988_v46  ;;  %404 = vmatpush.msra.mxu1 %v399_v45  ;;  %v998_v53 = vld [vmem:[#allocation8 + $0x58] sm:$0xff]  ;;  %v1001_v57 = vld [vmem:[#allocation8 + $0x50] sm:$0xff]  ;;  %v1004_v59 = vld [vmem:[#allocation8 + $0x48] sm:$0xff] }
  0x1d   :  { %235 = vmatpush.bf16.msra.mxu0 %v662_v2  ;;  %753 = vmatpush.bf16.msra.mxu3 %v662_v2  ;;  %v128_v33 = vcvt.s32.f32 %v112_v31  ;;  %v129_v34 = vcvt.s32.f32 %v113_v32  ;;  %v116_v48 = vunpack.c.0.s8 %v983_v43  ;;  %v117_v49 = vunpack.c.1.s8 %v983_v43  ;;  %v394_v61 = vld [vmem:[#allocation9 + $0x40] sm:$0xff]  ;;  %v393_v63 = vld [vmem:[#allocation9 + $0x38] sm:$0xff]  ;;  %v392_v1 = vld [vmem:[#allocation9 + $0x30] sm:$0xff] }
  0x1e   :  { %v130_v38 = vcvt.s32.f32 %v114_v36  ;;  %v131_v39 = vcvt.s32.f32 %v115_v37  ;;  %469 = vmatpush.msra.mxu2 %v990_v47  ;;  %405 = vmatpush.msra.mxu1 %v398_v50  ;;  %v1007_v62 = vld [vmem:[#allocation8 + $0x40] sm:$0xff]  ;;  %v1010_v0 = vld [vmem:[#allocation8 + $0x38] sm:$0xff]  ;;  %v376_v2 = vld [vmem:[#allocation8 + $0x30] sm:$0xff]  ;;  %v119_v6 = vunpack.c.3.s8 %v983_v43 }
  0x1f   :  { %v142_v35 = vpack.c.bf16 %v129_v34, %v128_v33  ;;  %v132_v54 = vcvt.s32.f32 %v116_v48  ;;  %v133_v55 = vcvt.s32.f32 %v117_v49  ;;  %v390_v7 = vld [vmem:[#allocation9 + $0x20] sm:$0xff]  ;;  %v389_v9 = vld [vmem:[#allocation9 + $0x18] sm:$0xff]  ;;  %v388_v13 = vld [vmem:[#allocation9 + $0x10] sm:$0xff] }
  0x20   :  { %v143_v40 = vpack.c.bf16 %v131_v39, %v130_v38  ;;  %470 = vmatpush.msra.mxu2 %v995_v51  ;;  %406 = vmatpush.msra.mxu1 %v397_v52  ;;  %v374_v8 = vld [vmem:[#allocation8 + $0x20] sm:$0xff]  ;;  %v373_v10 = vld [vmem:[#allocation8 + $0x18] sm:$0xff]  ;;  %v742_v14 = vld [vmem:[#allocation6 + $0x30] sm:$0xff]  }
  0x21   :  { %236 = vmatpush.bf16.msra.mxu0 %v661_v3  ;;  %754 = vmatpush.bf16.msra.mxu3 %v661_v3  ;;  %v144_v60 = vpack.c.bf16 %v133_v55, %v132_v54  ;;  %v391_v3 = vld [vmem:[#allocation9 + $0x28] sm:$0xff]  ;;  %v372_v15 = vld [vmem:[#allocation8 + $0x10] sm:$0xff]  ;;  %v691_v20 = vunpack.c.l.bf16 %v742_v14  ;;  %v370_v21 = vld [vmem:[#allocation8] sm:$0xff]  ;;  %v692_v22 = vunpack.c.h.bf16 %v742_v14 }
  0x22   :  { %471 = vmatpush.msra.mxu2 %v998_v53  ;;  %407 = vmatpush.msra.mxu1 %v396_v56  ;;  %v387_v16 = vld [vmem:[#allocation9 + $0x8] sm:$0xff]  ;;  %v666_v23 = vld [vmem:[#allocation6] sm:$0xff]   ;;  %v743_v25 = vld [vmem:[#allocation6 + $0x38] sm:$0xff]  }
  0x23   :  { %v667_v24 = vunpack.c.l.bf16 %v666_v23  ;;  %v695_v26 = vunpack.c.l.bf16 %v743_v25  ;;  %v668_v27 = vunpack.c.h.bf16 %v666_v23  ;;  %v738_v33 = vld [vmem:[#allocation6 + $0x10] sm:$0xff]  }
  0x24   :  { %472 = vmatpush.msra.mxu2 %v1001_v57  ;;  %408 = vmatpush.msra.mxu1 %v395_v58  ;;  %v675_v34 = vunpack.c.l.bf16 %v738_v33  ;;  %v676_v37 = vunpack.c.h.bf16 %v738_v33 }
  0x25   :  { %237 = vmatpush.bf16.msra.mxu0 %v660_v4  ;;  %755 = vmatpush.bf16.msra.mxu3 %v660_v4  ;;  %v375_v4 = vld [vmem:[#allocation8 + $0x28] sm:$0xff] }
  0x26   :  { %473 = vmatpush.msra.mxu2 %v1004_v59  ;;  %409 = vmatpush.msra.mxu1 %v394_v61 }
  0x28   :  { %474 = vmatpush.msra.mxu2 %v1007_v62  ;;  %410 = vmatpush.msra.mxu1 %v393_v63 }
  0x29   :  { %238 = vmatpush.bf16.msra.mxu0 %v659_v5  ;;  %756 = vmatpush.bf16.msra.mxu3 %v659_v5  ;;  %v118_v5 = vunpack.c.2.s8 %v983_v43 }
  0x2a   :  { %475 = vmatpush.msra.mxu2 %v1010_v0  ;;  %411 = vmatpush.msra.mxu1 %v392_v1 }
  0x2b   :  { %v134_v11 = vcvt.s32.f32 %v118_v5  ;;  %v1028_v5 = vld [vmem:[%s1056_s4] ss:$0 sm:$0xff]  ;;  %s937_s4 = smov [#allocation11]  }
  0x2c   :  { %476 = vmatpush.msra.mxu2 %v376_v2  ;;  %412 = vmatpush.msra.mxu1 %v391_v3  ;;  %s604_s15 = sshll.u32 %s937_s4, 4  ;;  %s605_s15 = int_to_ptr.vmem [resolvable:$true] %s604_s15 }
  0x2d   :  { %239 = vmatpush.bf16.msra.mxu0 %v658_v12  ;;  %757 = vmatpush.bf16.msra.mxu3 %v658_v12  ;;  %v135_v12 = vcvt.s32.f32 %v119_v6 }
  0x2e   :  { %477 = vmatpush.msra.mxu2 %v375_v4  ;;  %413 = vmatpush.msra.mxu1 %v390_v7 }
  0x30   :  { %478 = vmatpush.msra.mxu2 %v374_v8  ;;  %414 = vmatpush.msra.mxu1 %v389_v9 }
  0x31   :  { %240 = vmatpush.bf16.msra.mxu0 %v657_v17  ;;  %758 = vmatpush.bf16.msra.mxu3 %v657_v17  ;;  %v371_v17 = vld [vmem:[#allocation8 + $0x8] sm:$0xff] }
  0x32   :  { %479 = vmatpush.msra.mxu2 %v373_v10  ;;  %415 = vmatpush.msra.mxu1 %v388_v13 }
  0x34   :  { %241 = vmatmul.bf16.vlgmr.msra.gmra.mxu0 %v140_v18  ;;  %271 = vmatmul.bf16.vlgmr.msra.gmra.mxu3 %v146_v19  ;;  %v145_v18 = vpack.c.bf16 %v135_v12, %v134_v11  ;;  %v386_v19 = vld [vmem:[#allocation9] sm:$0xff] }
  0x35   :  { %759 = vmatpush.msrb.mxu3 %v401_v41  ;;  %480 = vmatpush.msra.mxu2 %v372_v15 }
  0x36   :  { %416 = vmatpush.msra.mxu1 %v387_v16 }
  0x37   :  { %760 = vmatpush.msrb.mxu3 %v400_v42  ;;  %481 = vmatpush.msra.mxu2 %v371_v17 }
  0x38   :  { %417 = vmatpush.msra.mxu1 %v386_v19 }
  0x39   :  { %761 = vmatpush.msrb.mxu3 %v399_v45  ;;  %482 = vmatpush.msra.mxu2 %v370_v21 }
  0x3a   :  { %418 = vmatmul.f32.vlgmr.msra.gmra.mxu1 %v667_v24 }
  0x3b   :  { %762 = vmatpush.msrb.mxu3 %v398_v50 }
  0x3d   :  { %763 = vmatpush.msrb.mxu3 %v397_v52  ;;  %v741_v52 = vld [vmem:[#allocation6 + $0x28] sm:$0xff]  }
  0x3e   :  { %v688_v55 = vunpack.c.h.bf16 %v741_v52 }
  0x3f   :  { %764 = vmatpush.msrb.mxu3 %v396_v56 }
  0x41   :  { %765 = vmatpush.msrb.mxu3 %v395_v58 }
  0x42   :  { %421 = vmatmul.f32.gmra.mxu1 %v668_v27 }
  0x43   :  { %766 = vmatpush.msrb.mxu3 %v394_v61 }
  0x44   :  { %246 = vmatmul.bf16.gmra.mxu0 %v141_v28  ;;  %276 = vmatmul.bf16.gmra.mxu3 %v147_v29  ;;  %v696_v28 = vunpack.c.h.bf16 %v743_v25  ;;  %v737_v29 = vld [vmem:[#allocation6 + $0x8] sm:$0xff]  }
  0x45   :  { %767 = vmatpush.msrb.mxu3 %v393_v63  ;;  %v671_v30 = vunpack.c.l.bf16 %v737_v29  ;;  %v672_v31 = vunpack.c.h.bf16 %v737_v29 }
  0x47   :  { %768 = vmatpush.msrb.mxu3 %v392_v1 }
  0x49   :  { %769 = vmatpush.msrb.mxu3 %v391_v3 }
  0x4a   :  { %424 = vmatmul.f32.gmra.mxu1 %v671_v30 }
  0x4b   :  { %770 = vmatpush.msrb.mxu3 %v390_v7 }
  0x4d   :  { %771 = vmatpush.msrb.mxu3 %v389_v9 }
  0x4f   :  { %772 = vmatpush.msrb.mxu3 %v388_v13 }
  0x51   :  { %773 = vmatpush.msrb.mxu3 %v387_v16 }
  0x52   :  { %427 = vmatmul.f32.gmra.mxu1 %v672_v31 }
  0x53   :  { %774 = vmatpush.msrb.mxu3 %v386_v19 }
  0x54   :  { %251 = vmatmul.bf16.gmra.mxu0 %v142_v35  ;;  %454 = vmatmul.f32.vlgmr.msrb.gmra.mxu3 %v691_v20 }
  0x55   :  { %775 = vmatpush.msra.mxu3 %v985_v44 }
  0x57   :  { %776 = vmatpush.msra.mxu3 %v988_v46 }
  0x59   :  { %777 = vmatpush.msra.mxu3 %v990_v47  ;;  %v740_v47 = vld [vmem:[#allocation6 + $0x20] sm:$0xff]  }
  0x5a   :  { %430 = vmatmul.f32.gmra.mxu1 %v675_v34  ;;  %v683_v48 = vunpack.c.l.bf16 %v740_v47  ;;  %v684_v50 = vunpack.c.h.bf16 %v740_v47 }
  0x5b   :  { %778 = vmatpush.msra.mxu3 %v995_v51 }
  0x5c   :  { %457 = vmatmul.f32.gmra.mxu3 %v692_v22 }
  0x5d   :  { %779 = vmatpush.msra.mxu3 %v998_v53  ;;  %v687_v53 = vunpack.c.l.bf16 %v741_v52 }
  0x5f   :  { %780 = vmatpush.msra.mxu3 %v1001_v57 }
  0x61   :  { %781 = vmatpush.msra.mxu3 %v1004_v59 }
  0x62   :  { %433 = vmatmul.f32.gmra.mxu1 %v676_v37 }
  0x63   :  { %782 = vmatpush.msra.mxu3 %v1007_v62 }
  0x64   :  { %256 = vmatmul.bf16.gmra.mxu0 %v143_v40  ;;  %460 = vmatmul.f32.gmra.mxu3 %v695_v26  ;;  %v739_v40 = vld [vmem:[#allocation6 + $0x18] sm:$0xff]  }
  0x65   :  { %783 = vmatpush.msra.mxu3 %v1010_v0  ;;  %v679_v41 = vunpack.c.l.bf16 %v739_v40  ;;  %v680_v44 = vunpack.c.h.bf16 %v739_v40 }
  0x67   :  { %784 = vmatpush.msra.mxu3 %v376_v2 }
  0x69   :  { %785 = vmatpush.msra.mxu3 %v375_v4 }
  0x6a   :  { %436 = vmatmul.f32.gmra.mxu1 %v679_v41 }
  0x6b   :  { %786 = vmatpush.msra.mxu3 %v374_v8 }
  0x6c   :  { %463 = vmatmul.f32.gmra.mxu3 %v696_v28 }
  0x6d   :  { %787 = vmatpush.msra.mxu3 %v373_v10 }
  0x6f   :  { %788 = vmatpush.msra.mxu3 %v372_v15 }
  0x71   :  { %789 = vmatpush.msra.mxu3 %v371_v17 }
  0x72   :  { %439 = vmatmul.f32.gmra.mxu1 %v680_v44 }
  0x73   :  { %790 = vmatpush.msra.mxu3 %v370_v21 }
  0x74   :  { %261 = vmatmul.bf16.gmra.mxu0 %v144_v60 }
  0x7a   :  { %442 = vmatmul.f32.gmra.mxu1 %v683_v48 }
  0x82   :  { %445 = vmatmul.f32.gmra.mxu1 %v684_v50 }
  0x84   :  { %266 = vmatmul.bf16.gmra.mxu0 %v145_v18 }
  0x8a   :  { %448 = vmatmul.f32.gmra.mxu1 %v687_v53 }
  0x92   :  { %451 = vmatmul.f32.gmra.mxu1 %v688_v55 }
  0xb1   :  { %v242_v32 = vpop.f32.mrf.mxu0 }
  0xb2   :  { %483 = vmatmul.f32.vlgmr.msra.gmra.mxu2 %v242_v32 }
  0xb7   :  { %v272_v35 = vpop.f32.mrf.mxu3  ;;  %v419_v61 = vpop.f32.mrf.mxu1 }
  0xb8   :  { %519 = vmatmul.f32.vlgmr.msra.gmra.mxu3 %v272_v35 }
  0xb9   :  { %v244_v36 = vpop.f32.mrf.mxu0 }
  0xba   :  { %486 = vmatmul.f32.gmra.mxu2 %v244_v36 }
  0xbf   :  { %v274_v38 = vpop.f32.mrf.mxu3  ;;  %v422_v63 = vpop.f32.mrf.mxu1 }
  0xc0   :  { %522 = vmatmul.f32.gmra.mxu3 %v274_v38 }
  0xc1   :  { %v247_v39 = vpop.f32.mrf.mxu0 }
  0xc2   :  { %489 = vmatmul.f32.gmra.mxu2 %v247_v39 }
  0xc7   :  { %v277_v42 = vpop.f32.mrf.mxu3  ;;  %v425_v1 = vpop.f32.mrf.mxu1 }
  0xc8   :  { %525 = vmatmul.f32.gmra.mxu3 %v277_v42 }
  0xc9   :  { %v249_v43 = vpop.f32.mrf.mxu0 }
  0xca   :  { %492 = vmatmul.f32.gmra.mxu2 %v249_v43 }
  0xcf   :  { %v279_v45 = vpop.f32.mrf.mxu3  ;;  %v428_v6 = vpop.f32.mrf.mxu1 }
  0xd0   :  { %528 = vmatmul.f32.gmra.mxu3 %v279_v45 }
  0xd1   :  { %v252_v46 = vpop.f32.mrf.mxu0 }
  0xd2   :  { %495 = vmatmul.f32.gmra.mxu2 %v252_v46 }
  0xd7   :  { %v455_v60 = vpop.f32.mrf.mxu3  ;;  %v431_v20 = vpop.f32.mrf.mxu1 }
  0xd9   :  { %v254_v49 = vpop.f32.mrf.mxu0 }
  0xda   :  { %498 = vmatmul.f32.gmra.mxu2 %v254_v49 }
  0xdf   :  { %v458_v62 = vpop.f32.mrf.mxu3  ;;  %v434_v31 = vpop.f32.mrf.mxu1 }
  0xe1   :  { %v257_v51 = vpop.f32.mrf.mxu0 }
  0xe2   :  { %501 = vmatmul.f32.gmra.mxu2 %v257_v51 }
  0xe7   :  { %v461_v0 = vpop.f32.mrf.mxu3  ;;  %v437_v43 = vpop.f32.mrf.mxu1 }
  0xe9   :  { %v259_v54 = vpop.f32.mrf.mxu0 }
  0xea   :  { %504 = vmatmul.f32.gmra.mxu2 %v259_v54 }
  0xef   :  { %v464_v2 = vpop.f32.mrf.mxu3  ;;  %v440_v52 = vpop.f32.mrf.mxu1 }
  0xf1   :  { %v262_v56 = vpop.f32.mrf.mxu0 }
  0xf2   :  { %507 = vmatmul.f32.gmra.mxu2 %v262_v56 }
  0xf9   :  { %v264_v57 = vpop.f32.mrf.mxu0 }
  0xfa   :  { %510 = vmatmul.f32.gmra.mxu2 %v264_v57  ;;  %v443_v57 = vpop.f32.mrf.mxu1 }
 0x101   :  { %v267_v58 = vpop.f32.mrf.mxu0 }
 0x102   :  { %513 = vmatmul.f32.gmra.mxu2 %v267_v58 }
 0x109   :  { %v269_v59 = vpop.f32.mrf.mxu0 }
 0x10a   :  { %516 = vmatmul.f32.gmra.mxu2 %v269_v59 }
 0x135   :  { %v484_v3 = vpop.f32.mrf.mxu2 }
 0x136   :  { %v485_v4 = vadd.f32 %v484_v3, %v419_v61 }
 0x138   :  { %v536_v9 = vadd.f32 %v1028_v5, %v485_v4 }
 0x13a   :  { %v552_v13 = vmax.f32 %v536_v9, 0.0 }
 0x13b   :  { %v520_v7 = vpop.f32.mrf.mxu3 }
 0x13c   :  { %v521_v11 = vadd.f32 %v520_v7, %v455_v60 }
 0x13d   :  { %v487_v8 = vpop.f32.mrf.mxu2 }
 0x13e   :  { %v488_v10 = vadd.f32 %v487_v8, %v422_v63  ;;  %v548_v15 = vadd.f32 %v1028_v5, %v521_v11 }
 0x140   :  { %v537_v12 = vadd.f32 %v1028_v5, %v488_v10  ;;  %v564_v21 = vmax.f32 %v548_v15, 0.0 }
 0x142   :  { %v553_v14 = vmax.f32 %v537_v12, 0.0 }
 0x143   :  { %v523_v16 = vpop.f32.mrf.mxu3 }
 0x144   :  { %v700_v17 = vpack.c.bf16 %v553_v14, %v552_v13  ;;  %v524_v18 = vadd.f32 %v523_v16, %v458_v62 }
 0x145   :  { %v490_v19 = vpop.f32.mrf.mxu2 }
 0x146   :  { %701 = vst [vmem:[#allocation11] sm:$0xff] %v700_v17   ;;  %v549_v22 = vadd.f32 %v1028_v5, %v524_v18  ;;  %v491_v24 = vadd.f32 %v490_v19, %v425_v1  ;;  %v446_v1 = vpop.f32.mrf.mxu1 }
 0x148   :  { %v565_v23 = vmax.f32 %v549_v22, 0.0  ;;  %v538_v28 = vadd.f32 %v1028_v5, %v491_v24 }
 0x14a   :  { %v730_v25 = vpack.c.bf16 %v565_v23, %v564_v21  ;;  %v554_v33 = vmax.f32 %v538_v28, 0.0 }
 0x14b   :  { %v526_v26 = vpop.f32.mrf.mxu3 }
 0x14c   :  { %749 = vst [vmem:[#allocation11 + $0x30] sm:$0xff] %v730_v25   ;;  %v527_v30 = vadd.f32 %v526_v26, %v461_v0 }
 0x14d   :  { %v493_v27 = vpop.f32.mrf.mxu2 }
 0x14e   :  { %v494_v29 = vadd.f32 %v493_v27, %v428_v6  ;;  %v550_v35 = vadd.f32 %v1028_v5, %v527_v30  ;;  %v449_v8 = vpop.f32.mrf.mxu1 }
 0x150   :  { %v539_v32 = vadd.f32 %v1028_v5, %v494_v29  ;;  %v566_v40 = vmax.f32 %v550_v35, 0.0 }
 0x152   :  { %v555_v34 = vmax.f32 %v539_v32, 0.0 }
 0x153   :  { %v529_v36 = vpop.f32.mrf.mxu3 }
 0x154   :  { %v705_v37 = vpack.c.bf16 %v555_v34, %v554_v33  ;;  %v530_v38 = vadd.f32 %v529_v36, %v464_v2 }
 0x155   :  { %v496_v39 = vpop.f32.mrf.mxu2 }
 0x156   :  { %744 = vst [vmem:[#allocation11 + $0x8] sm:$0xff] %v705_v37   ;;  %v551_v41 = vadd.f32 %v1028_v5, %v530_v38  ;;  %v497_v44 = vadd.f32 %v496_v39, %v431_v20  ;;  %v452_v14 = vpop.f32.mrf.mxu1 }
 0x158   :  { %v567_v42 = vmax.f32 %v551_v41, 0.0  ;;  %v540_v47 = vadd.f32 %v1028_v5, %v497_v44 }
 0x15a   :  { %v735_v45 = vpack.c.bf16 %v567_v42, %v566_v40  ;;  %v556_v50 = vmax.f32 %v540_v47, 0.0 }
 0x15c   :  { %750 = vst [vmem:[#allocation11 + $0x38] sm:$0xff] %v735_v45  }
 0x15d   :  { %v499_v46 = vpop.f32.mrf.mxu2 }
 0x15e   :  { %v500_v48 = vadd.f32 %v499_v46, %v434_v31 }
 0x160   :  { %v541_v49 = vadd.f32 %v1028_v5, %v500_v48 }
 0x162   :  { %v557_v51 = vmax.f32 %v541_v49, 0.0 }
 0x164   :  { %v710_v53 = vpack.c.bf16 %v557_v51, %v556_v50 }
 0x165   :  { %v502_v54 = vpop.f32.mrf.mxu2 }
 0x166   :  { %745 = vst [vmem:[#allocation11 + $0x10] sm:$0xff] %v710_v53   ;;  %v503_v55 = vadd.f32 %v502_v54, %v437_v43 }
 0x168   :  { %v542_v58 = vadd.f32 %v1028_v5, %v503_v55 }
 0x16a   :  { %v558_v61 = vmax.f32 %v542_v58, 0.0 }
 0x16d   :  { %v505_v56 = vpop.f32.mrf.mxu2 }
 0x16e   :  { %v506_v59 = vadd.f32 %v505_v56, %v440_v52 }
 0x170   :  { %v543_v60 = vadd.f32 %v1028_v5, %v506_v59 }
 0x172   :  { %v559_v62 = vmax.f32 %v543_v60, 0.0 }
 0x174   :  { %v715_v63 = vpack.c.bf16 %v559_v62, %v558_v61 }
 0x175   :  { %v508_v0 = vpop.f32.mrf.mxu2 }
 0x176   :  { %746 = vst [vmem:[#allocation11 + $0x18] sm:$0xff] %v715_v63   ;;  %v509_v2 = vadd.f32 %v508_v0, %v443_v57 }
 0x178   :  { %v544_v4 = vadd.f32 %v1028_v5, %v509_v2 }
 0x17a   :  { %v560_v9 = vmax.f32 %v544_v4, 0.0 }
 0x17d   :  { %v511_v3 = vpop.f32.mrf.mxu2 }
 0x17e   :  { %v512_v6 = vadd.f32 %v511_v3, %v446_v1 }
 0x180   :  { %v545_v7 = vadd.f32 %v1028_v5, %v512_v6 }
 0x182   :  { %v561_v10 = vmax.f32 %v545_v7, 0.0 }
 0x184   :  { %v720_v11 = vpack.c.bf16 %v561_v10, %v560_v9 }
 0x185   :  { %v514_v12 = vpop.f32.mrf.mxu2 }
 0x186   :  { %747 = vst [vmem:[#allocation11 + $0x20] sm:$0xff] %v720_v11   ;;  %v515_v13 = vadd.f32 %v514_v12, %v449_v8 }
 0x188   :  { %v546_v16 = vadd.f32 %v1028_v5, %v515_v13 }
 0x18a   :  { %v562_v19 = vmax.f32 %v546_v16, 0.0 }
 0x18d   :  { %v517_v15 = vpop.f32.mrf.mxu2 }
 0x18e   :  { %v518_v17 = vadd.f32 %v517_v15, %v452_v14 }
 0x190   :  { %v547_v18 = vadd.f32 %v1028_v5, %v518_v17 }
 0x192   :  { %v563_v20 = vmax.f32 %v547_v18, 0.0 }
 0x194   :  { %v725_v21 = vpack.c.bf16 %v563_v20, %v562_v19 }
 0x196   :  { %748 = vst [vmem:[#allocation11 + $0x28] sm:$0xff] %v725_v21  }
 0x197   :  { %612 = dma.vmem_to_hbm [thread:$0]  %s605_s15, 1024, %s607_s18, [#allocation5], %s930_s26, %s930_s26, %s931_s27  }
 0x198   :  { %927 = dma.done.wait [#allocation5], 1024  }
 0x199   :  { %928 = vsyncadd [#allocation5], 4294966272 }
 0x19a   :  { %617 = vsyncpa [#allocation4], 1 }
 0x19b   :  { %618 = vsyncpa [#allocation7], 1 }
 0x19c   :  { %619 = vsyncpa [#allocation10], 1 }
 0x19d   :  { %620 = vsyncpa [#allocation5], 1 }

</bundles_post_ra>
